<compile_context>
chip_gen: v7x
topology: tpu7x:2x2x1
jax: 0.10.0
libtpu: 0.0.40
codegen_flags: <defaults>
</compile_context>

<pallas_src>
import jax
import jax.numpy as jnp
from jax.experimental import pallas as pl
from jax.experimental.pallas import tpu as pltpu


LANE = 128  # TPU lane width; pad feature dims up to this for lane-dense stores


def _round_up(n, m):
    return ((n + m - 1) // m) * m


def autoencoder_kernel(
    x_ref,           # [TB, D]   f32 activation tile (batch-tiled)
    w1_ref, b1_ref,  # [D, HP] bf16, [1, HP] f32
    w2_ref, b2_ref,  # [HP, LP] bf16, [1, LP] f32
    w3_ref, b3_ref,  # [LP, HP] bf16, [1, HP] f32
    w4_ref, b4_ref,  # [HP, D] bf16, [1, D]  f32
    codes_ref,       # out: [TB, LP] f32
    dec_ref,         # out: [TB, D]  f32
):
    # Hoist bias loads/broadcast sources once per invocation.
    b1 = b1_ref[...]
    b2 = b2_ref[...]
    b3 = b3_ref[...]
    b4 = b4_ref[...]

    # bf16 MXU inputs, f32 accumulation on every dot.
    x = x_ref[...].astype(jnp.bfloat16)

    # ---- encoder ----
    h1 = jnp.dot(x, w1_ref[...], preferred_element_type=jnp.float32) + b1
    h1 = jnp.maximum(h1, 0.0)                                   # ReLU (f32)
    codes = jnp.dot(h1.astype(jnp.bfloat16), w2_ref[...],
                    preferred_element_type=jnp.float32) + b2

    # ---- decoder ----
    h2 = jnp.dot(codes.astype(jnp.bfloat16), w3_ref[...],
                 preferred_element_type=jnp.float32) + b3
    h2 = jnp.maximum(h2, 0.0)                                   # ReLU (f32)
    out = jnp.dot(h2.astype(jnp.bfloat16), w4_ref[...],
                  preferred_element_type=jnp.float32) + b4
    out = jax.nn.sigmoid(out)                                   # Sigmoid (f32)

    codes_ref[...] = codes.astype(codes_ref.dtype)
    dec_ref[...] = out.astype(dec_ref.dtype)


def autoencoder_forward(x_flat, params, *, latent_dim, tb=128):
    """x_flat: [B, D] float32. params: dict of (padded) weights/biases.

    Returns (codes [B, latent_dim], decoded [B, D]) — the un-padded results.
    """
    B, D = x_flat.shape
    HP = params["w1"].shape[1]   # lane-padded hidden width
    LP = params["w2"].shape[1]   # lane-padded latent width

    # Pad batch up to a multiple of the MXU-aligned tile (tb is a multiple of 8).
    B_pad = _round_up(max(B, 1), tb)
    if B_pad != B:
        x_flat = jnp.pad(x_flat, ((0, B_pad - B), (0, 0)))

    grid = (B_pad // tb,)

    # Batch-tiled activations / outputs.
    def tile_spec(shape):
        return pl.BlockSpec(shape, lambda i: (i, 0))

    # Weights & biases: constant block index -> resident in VMEM across iters.
    def resident_spec(shape):
        return pl.BlockSpec(shape, lambda i: (0, 0))

    operands = (
        x_flat,
        params["w1"], params["b1"],
        params["w2"], params["b2"],
        params["w3"], params["b3"],
        params["w4"], params["b4"],
    )

    in_specs = [tile_spec((tb, D))] + [resident_spec(p.shape) for p in operands[1:]]
    out_specs = (tile_spec((tb, LP)), tile_spec((tb, D)))

    codes_p, dec_p = pl.pallas_call(
        autoencoder_kernel,
        grid=grid,
        in_specs=in_specs,
        out_specs=out_specs,
        out_shape=(
            jax.ShapeDtypeStruct((B_pad, LP), jnp.float32),
            jax.ShapeDtypeStruct((B_pad, D), jnp.float32),
        ),
        compiler_params=pltpu.CompilerParams(
            dimension_semantics=("parallel",),     # v7x: shard batch tiles over 2 TCs
            vmem_limit_bytes=32 * 1024 * 1024,     # explicit budget; safe on v5e/v6e/v7x
        ),
    )(*operands)

    # Slice away batch padding and lane padding of the latent dim.
    return codes_p[:B, :latent_dim], dec_p[:B, :]


def init_params(key, D, H, L):
    """Deterministic Glorot-like init at the *true* sizes, then zero-padded to
    lane-dense (128-wide) hidden/latent dims and cast to bf16 (weights only)."""
    HP = _round_up(H, LANE)
    LP = _round_up(L, LANE)
    ks = jax.random.split(key, 4)

    def lin(k, fan_in, fan_out, pad_in, pad_out):
        scale = jnp.sqrt(2.0 / (fan_in + fan_out)).astype(jnp.float32)
        w = jax.random.normal(k, (fan_in, fan_out), dtype=jnp.float32) * scale
        w = jnp.pad(w, ((0, pad_in - fan_in), (0, pad_out - fan_out)))
        b = jnp.zeros((1, pad_out), dtype=jnp.float32)
        return w.astype(jnp.bfloat16), b

    w1, b1 = lin(ks[0], D, H, D, HP)    # encoder layer 1
    w2, b2 = lin(ks[1], H, L, HP, LP)   # encoder layer 2 (-> latent)
    w3, b3 = lin(ks[2], L, H, LP, HP)   # decoder layer 1
    w4, b4 = lin(ks[3], H, D, HP, D)    # decoder layer 2 (-> reconstruction)
    return dict(w1=w1, b1=b1, w2=w2, b2=b2, w3=w3, b3=b3, w4=w4, b4=b4)


if __name__ == "__main__":
    # Small shapes consistent with the module: image batch [B, C, H, W] = [2, 1, 16, 16]
    B, C, Himg, Wimg = 2, 1, 16, 16
    D = C * Himg * Wimg        # 256 flattened features
    HID = 64                   # hidden width (padded to 128 internally)
    LATENT = 32                # latent_space_dim (padded to 128 internally)

    key = jax.random.PRNGKey(0)
    k_x, k_p = jax.random.split(key)

    x_nchw = jax.random.uniform(k_x, (B, C, Himg, Wimg), dtype=jnp.float32)
    x_flat = x_nchw.reshape(B, D)   # layout: flatten NCHW -> [B, D]

    params = init_params(k_p, D, HID, LATENT)

    codes, decoded = autoencoder_forward(x_flat, params, latent_dim=LATENT)
    jax.block_until_ready((codes, decoded))

    assert codes.shape == (B, LATENT)
    assert decoded.shape == (B, D)
    assert bool(jnp.all(jnp.isfinite(codes))) and bool(jnp.all(jnp.isfinite(decoded)))
    print("KERNEL_OK")
</pallas_src>

<mosaic_0001>
module attributes {stable_mosaic.version = 11 : i64} {
  func.func @autoencoder_kernel(%arg0: i32, %arg1: memref<128x256xf32, #tpu.memory_space<vmem>>, %arg2: memref<256x128xbf16, #tpu.memory_space<vmem>>, %arg3: memref<1x128xf32, #tpu.memory_space<vmem>>, %arg4: memref<128x128xbf16, #tpu.memory_space<vmem>>, %arg5: memref<1x128xf32, #tpu.memory_space<vmem>>, %arg6: memref<128x128xbf16, #tpu.memory_space<vmem>>, %arg7: memref<1x128xf32, #tpu.memory_space<vmem>>, %arg8: memref<128x256xbf16, #tpu.memory_space<vmem>>, %arg9: memref<1x256xf32, #tpu.memory_space<vmem>>, %arg10: memref<128x128xf32, #tpu.memory_space<vmem>>, %arg11: memref<128x256xf32, #tpu.memory_space<vmem>>) attributes {dimension_semantics = [#tpu.dimension_semantics<parallel>], iteration_bounds = array<i64: 1>, scalar_prefetch = 0 : i64, scratch_operands = 0 : i64, tpu.core_type = #tpu.core_type<tc>, window_params = [{transform_indices = @transform_0, window_bounds = array<i64: 128, 256>}, {pipeline_mode = #tpu.pipeline_mode<synchronous>, transform_indices = @transform_1, window_bounds = array<i64: 256, 128>}, {pipeline_mode = #tpu.pipeline_mode<synchronous>, transform_indices = @transform_2, window_bounds = array<i64: 1, 128>}, {pipeline_mode = #tpu.pipeline_mode<synchronous>, transform_indices = @transform_3, window_bounds = array<i64: 128, 128>}, {pipeline_mode = #tpu.pipeline_mode<synchronous>, transform_indices = @transform_4, window_bounds = array<i64: 1, 128>}, {pipeline_mode = #tpu.pipeline_mode<synchronous>, transform_indices = @transform_5, window_bounds = array<i64: 128, 128>}, {pipeline_mode = #tpu.pipeline_mode<synchronous>, transform_indices = @transform_6, window_bounds = array<i64: 1, 128>}, {pipeline_mode = #tpu.pipeline_mode<synchronous>, transform_indices = @transform_7, window_bounds = array<i64: 128, 256>}, {pipeline_mode = #tpu.pipeline_mode<synchronous>, transform_indices = @transform_8, window_bounds = array<i64: 1, 256>}, {transform_indices = @transform_9, window_bounds = array<i64: 128, 128>}, {transform_indices = @transform_10, window_bounds = array<i64: 128, 256>}]} {
    %c0 = arith.constant 0 : index
    %c0_0 = arith.constant 0 : index
    %0 = vector.load %arg3[%c0, %c0_0] : memref<1x128xf32, #tpu.memory_space<vmem>>, vector<1x128xf32>
    %c0_1 = arith.constant 0 : index
    %c0_2 = arith.constant 0 : index
    %1 = vector.load %arg5[%c0_1, %c0_2] : memref<1x128xf32, #tpu.memory_space<vmem>>, vector<1x128xf32>
    %c0_3 = arith.constant 0 : index
    %c0_4 = arith.constant 0 : index
    %2 = vector.load %arg7[%c0_3, %c0_4] : memref<1x128xf32, #tpu.memory_space<vmem>>, vector<1x128xf32>
    %c0_5 = arith.constant 0 : index
    %c0_6 = arith.constant 0 : index
    %3 = vector.load %arg9[%c0_5, %c0_6] : memref<1x256xf32, #tpu.memory_space<vmem>>, vector<1x256xf32>
    %c0_7 = arith.constant 0 : index
    %c0_8 = arith.constant 0 : index
    %4 = vector.load %arg1[%c0_7, %c0_8] : memref<128x256xf32, #tpu.memory_space<vmem>>, vector<128x256xf32>
    %5 = arith.truncf %4 : vector<128x256xf32> to vector<128x256xbf16>
    %c0_9 = arith.constant 0 : index
    %c0_10 = arith.constant 0 : index
    %6 = vector.load %arg2[%c0_9, %c0_10] : memref<256x128xbf16, #tpu.memory_space<vmem>>, vector<256x128xbf16>
    %cst = arith.constant dense<0.000000e+00> : vector<128x128xf32>
    %7 = tpu.matmul %5, %6, %cst {dimension_numbers = #tpu.dot_dimension_numbers<[1], [0], [0], [1], [0, 0, 1, 1], [], []>} : vector<128x256xbf16>, vector<256x128xbf16>, vector<128x128xf32> -> vector<128x128xf32>
    %8 = vector.broadcast %0 : vector<1x128xf32> to vector<128x128xf32>
    %9 = arith.addf %7, %8 : vector<128x128xf32>
    %cst_11 = arith.constant 0.000000e+00 : f32
    %10 = vector.broadcast %cst_11 : f32 to vector<128x128xf32>
    %11 = arith.maximumf %9, %10 : vector<128x128xf32>
    %12 = arith.truncf %11 : vector<128x128xf32> to vector<128x128xbf16>
    %c0_12 = arith.constant 0 : index
    %c0_13 = arith.constant 0 : index
    %13 = vector.load %arg4[%c0_12, %c0_13] : memref<128x128xbf16, #tpu.memory_space<vmem>>, vector<128x128xbf16>
    %cst_14 = arith.constant dense<0.000000e+00> : vector<128x128xf32>
    %14 = tpu.matmul %12, %13, %cst_14 {dimension_numbers = #tpu.dot_dimension_numbers<[1], [0], [0], [1], [0, 0, 1, 1], [], []>} : vector<128x128xbf16>, vector<128x128xbf16>, vector<128x128xf32> -> vector<128x128xf32>
    %15 = vector.broadcast %1 : vector<1x128xf32> to vector<128x128xf32>
    %16 = arith.addf %14, %15 : vector<128x128xf32>
    %17 = arith.truncf %16 : vector<128x128xf32> to vector<128x128xbf16>
    %c0_15 = arith.constant 0 : index
    %c0_16 = arith.constant 0 : index
    %18 = vector.load %arg6[%c0_15, %c0_16] : memref<128x128xbf16, #tpu.memory_space<vmem>>, vector<128x128xbf16>
    %cst_17 = arith.constant dense<0.000000e+00> : vector<128x128xf32>
    %19 = tpu.matmul %17, %18, %cst_17 {dimension_numbers = #tpu.dot_dimension_numbers<[1], [0], [0], [1], [0, 0, 1, 1], [], []>} : vector<128x128xbf16>, vector<128x128xbf16>, vector<128x128xf32> -> vector<128x128xf32>
    %20 = vector.broadcast %2 : vector<1x128xf32> to vector<128x128xf32>
    %21 = arith.addf %19, %20 : vector<128x128xf32>
    %cst_18 = arith.constant 0.000000e+00 : f32
    %22 = vector.broadcast %cst_18 : f32 to vector<128x128xf32>
    %23 = arith.maximumf %21, %22 : vector<128x128xf32>
    %24 = arith.truncf %23 : vector<128x128xf32> to vector<128x128xbf16>
    %c0_19 = arith.constant 0 : index
    %c0_20 = arith.constant 0 : index
    %25 = vector.load %arg8[%c0_19, %c0_20] : memref<128x256xbf16, #tpu.memory_space<vmem>>, vector<128x256xbf16>
    %cst_21 = arith.constant dense<0.000000e+00> : vector<128x256xf32>
    %26 = tpu.matmul %24, %25, %cst_21 {dimension_numbers = #tpu.dot_dimension_numbers<[1], [0], [0], [1], [0, 0, 1, 1], [], []>} : vector<128x128xbf16>, vector<128x256xbf16>, vector<128x256xf32> -> vector<128x256xf32>
    %27 = vector.broadcast %3 : vector<1x256xf32> to vector<128x256xf32>
    %28 = arith.addf %26, %27 : vector<128x256xf32>
    %29 = arith.negf %28 : vector<128x256xf32>
    %30 = math.exp %29 : vector<128x256xf32>
    %cst_22 = arith.constant 1.000000e+00 : f32
    %31 = vector.broadcast %cst_22 : f32 to vector<128x256xf32>
    %32 = arith.addf %31, %30 : vector<128x256xf32>
    %33 = arith.divf %31, %32 : vector<128x256xf32>
    %c0_23 = arith.constant 0 : index
    %c0_24 = arith.constant 0 : index
    %34 = vector.load %arg10[%c0_23, %c0_24] : memref<128x128xf32, #tpu.memory_space<vmem>>, vector<128x128xf32>
    tpu.vector_store %arg10[%c0_23, %c0_24], %16 {strides = array<i32>} : memref<128x128xf32, #tpu.memory_space<vmem>>, vector<128x128xf32>,
    %c0_25 = arith.constant 0 : index
    %c0_26 = arith.constant 0 : index
    %35 = vector.load %arg11[%c0_25, %c0_26] : memref<128x256xf32, #tpu.memory_space<vmem>>, vector<128x256xf32>
    tpu.vector_store %arg11[%c0_25, %c0_26], %33 {strides = array<i32>} : memref<128x256xf32, #tpu.memory_space<vmem>>, vector<128x256xf32>,
    return
  }
  func.func @transform_0(%arg0: i32) -> (i32, i32) {
    %c0_i32 = arith.constant 0 : i32
    %c0_i32_0 = arith.constant 0 : i32
    return %arg0, %c0_i32 : i32, i32
  }
  func.func @transform_1(%arg0: i32) -> (i32, i32) {
    %c0_i32 = arith.constant 0 : i32
    %c0_i32_0 = arith.constant 0 : i32
    %c0_i32_1 = arith.constant 0 : i32
    return %c0_i32, %c0_i32_0 : i32, i32
  }
  func.func @transform_2(%arg0: i32) -> (i32, i32) {
    %c0_i32 = arith.constant 0 : i32
    %c0_i32_0 = arith.constant 0 : i32
    %c0_i32_1 = arith.constant 0 : i32
    return %c0_i32, %c0_i32_0 : i32, i32
  }
  func.func @transform_3(%arg0: i32) -> (i32, i32) {
    %c0_i32 = arith.constant 0 : i32
    %c0_i32_0 = arith.constant 0 : i32
    %c0_i32_1 = arith.constant 0 : i32
    return %c0_i32, %c0_i32_0 : i32, i32
  }
  func.func @transform_4(%arg0: i32) -> (i32, i32) {
    %c0_i32 = arith.constant 0 : i32
    %c0_i32_0 = arith.constant 0 : i32
    %c0_i32_1 = arith.constant 0 : i32
    return %c0_i32, %c0_i32_0 : i32, i32
  }
  func.func @transform_5(%arg0: i32) -> (i32, i32) {
    %c0_i32 = arith.constant 0 : i32
    %c0_i32_0 = arith.constant 0 : i32
    %c0_i32_1 = arith.constant 0 : i32
    return %c0_i32, %c0_i32_0 : i32, i32
  }
  func.func @transform_6(%arg0: i32) -> (i32, i32) {
    %c0_i32 = arith.constant 0 : i32
    %c0_i32_0 = arith.constant 0 : i32
    %c0_i32_1 = arith.constant 0 : i32
    return %c0_i32, %c0_i32_0 : i32, i32
  }
  func.func @transform_7(%arg0: i32) -> (i32, i32) {
    %c0_i32 = arith.constant 0 : i32
    %c0_i32_0 = arith.constant 0 : i32
    %c0_i32_1 = arith.constant 0 : i32
    return %c0_i32, %c0_i32_0 : i32, i32
  }
  func.func @transform_8(%arg0: i32) -> (i32, i32) {
    %c0_i32 = arith.constant 0 : i32
    %c0_i32_0 = arith.constant 0 : i32
    %c0_i32_1 = arith.constant 0 : i32
    return %c0_i32, %c0_i32_0 : i32, i32
  }
  func.func @transform_9(%arg0: i32) -> (i32, i32) {
    %c0_i32 = arith.constant 0 : i32
    %c0_i32_0 = arith.constant 0 : i32
    return %arg0, %c0_i32 : i32, i32
  }
  func.func @transform_10(%arg0: i32) -> (i32, i32) {
    %c0_i32 = arith.constant 0 : i32
    %c0_i32_0 = arith.constant 0 : i32
    return %arg0, %c0_i32 : i32, i32
  }
}

</mosaic_0001>

<bundles_post_ra>
// kernel: tpu_custom_call.1
= control target key start
LH: loop header
LB: loop body
LE: loop exit
PB: predicated region body
PF: predicated region fallthrough
CT: control target
= control target key end

     0   :  { %16 = vsyncpa [#allocation3], 0  ;;  %s2149_s0 = inlined_call_operand.hbm [shape: f32[128,256], index: 0, kind: input, shape index: {}]   ;;  %s2150_s1 = inlined_call_operand.hbm [shape: bf16[256,128], index: 1, kind: input, shape index: {}]   ;;  %s2151_s2 = inlined_call_operand.vmem [shape: f32[1,128], index: 2, kind: input, shape index: {}]   ;;  %s2152_s3 = inlined_call_operand.hbm [shape: bf16[128,128], index: 3, kind: input, shape index: {}]   ;;  %s2153_s4 = inlined_call_operand.vmem [shape: f32[1,128], index: 4, kind: input, shape index: {}]   ;;  %s2154_s5 = inlined_call_operand.hbm [shape: bf16[128,128], index: 5, kind: input, shape index: {}]   ;;  %s2155_s6 = inlined_call_operand.vmem [shape: f32[1,128], index: 6, kind: input, shape index: {}]   ;;  %s2156_s7 = inlined_call_operand.hbm [shape: bf16[128,256], index: 7, kind: input, shape index: {}]   ;;  %s2157_s8 = inlined_call_operand.vmem [shape: f32[1,256], index: 8, kind: input, shape index: {}]   ;;  %s2158_s9 = inlined_call_operand.hbm [shape: f32[128,128], index: 9, kind: output, shape index: {0}]   ;;  %s2159_s10 = inlined_call_operand.hbm [shape: f32[128,256], index: 10, kind: output, shape index: {1}]  }
   0x1   :  { %17 = vsyncpa [#allocation6], 0 }
   0x2   :  { %18 = vsyncpa [#allocation9], 0 }
   0x3   :  { %19 = vsyncpa [#allocation4], 0 }
   0x4   :  { %20 = vsyncpa [#allocation13], 0  ;;  %s1894_s13 = smov [#allocation5]   ;;  %s1730_s17 = scalar_lea.hbm %s2150_s1, 2048 }
   0x5   :  { %s38_s14 = sshll.u32 %s1894_s13, 4  ;;  %p1731_p0 = scmp.ne.s32.totalorder %s2150_s1, %s1730_s17  ;;  %s39_s14 = int_to_ptr.vmem [resolvable:$true] %s38_s14 }
   0x6   :  { %p1734_p1 = scmp.lt.u32.totalorder %s1730_s17, %s2150_s1 }
   0x8   :  { %p1736_p2 = pnand %p1734_p1, %p1731_p0 }
   0xa   :  { %1739 = shalt.err (!%p1736_p2)
}
   0xb   :  { %s1740_s22 = scalar_lea.vmem %s39_s14, 2048  ;;  %p1745_p4 = scmp.lt.s32.totalorder %s39_s14, %s39_s14 }
   0xc   :  { %p1741_p3 = scmp.ne.s32.totalorder %s39_s14, %s1740_s22  ;;  %p1746_p5 = scmp.lt.s32.totalorder %s1740_s22, %s1740_s22 }
   0xe   :  { %p1747_p6 = por %p1746_p5, %p1745_p4 }
  0x10   :  { %p1748_p7 = pnand %p1747_p6, %p1741_p3 }
  0x12   :  { %1751 = shalt.err (!%p1748_p7)
}
  0x13   :  { %s1895_s23 = smov 64   ;;  %s1896_s24 = smov 4  }
  0x14   :  { %44 = dma.hbm_to_vmem [thread:$0]  %s2150_s1, 2048, %s39_s14, [#allocation6], %s1895_s23, %s1895_s23, %s1896_s24  }
  0x15   :  { %s1897_s27 = smov [#allocation8]   ;;  %s1898_s29 = smov [#allocation2]  }
  0x16   :  { %s66_s28 = sshll.u32 %s1897_s27, 4  ;;  %s26_s30 = sshll.u32 %s1898_s29, 4  ;;  %s67_s28 = int_to_ptr.vmem [resolvable:$true] %s66_s28  ;;  %s27_s30 = int_to_ptr.vmem [resolvable:$true] %s26_s30 }
  0x17   :  { %s1752_s13 = scalar_lea.hbm %s2154_s5, 1024 }
  0x18   :  { %p1753_p8 = scmp.ne.s32.totalorder %s2154_s5, %s1752_s13  ;;  %p1756_p9 = scmp.lt.u32.totalorder %s1752_s13, %s2154_s5 }
  0x1a   :  { %p1758_p10 = pnand %p1756_p9, %p1753_p8 }
  0x1c   :  { %1761 = shalt.err (!%p1758_p10)
}
  0x1d   :  { %s1762_s1 = scalar_lea.vmem %s67_s28, 1024  ;;  %p1767_p12 = scmp.lt.s32.totalorder %s67_s28, %s67_s28 }
  0x1e   :  { %p1763_p11 = scmp.ne.s32.totalorder %s67_s28, %s1762_s1  ;;  %p1768_p13 = scmp.lt.s32.totalorder %s1762_s1, %s1762_s1 }
  0x20   :  { %p1769_p0 = por %p1768_p13, %p1767_p12 }
  0x22   :  { %p1770_p1 = pnand %p1769_p0, %p1763_p11 }
  0x24   :  { %1773 = shalt.err (!%p1770_p1)
}
  0x25   :  { %72 = dma.hbm_to_vmem [thread:$0]  %s2154_s5, 1024, %s67_s28, [#allocation9], %s1895_s23, %s1895_s23, %s1896_s24  }
  0x26   :  { %s1774_s22 = scalar_lea.hbm %s2149_s0, 4096 }
  0x27   :  { %p1775_p2 = scmp.ne.s32.totalorder %s2149_s0, %s1774_s22  ;;  %p1778_p3 = scmp.lt.u32.totalorder %s1774_s22, %s2149_s0 }
  0x29   :  { %p1780_p4 = pnand %p1778_p3, %p1775_p2 }
  0x2b   :  { %1783 = shalt.err (!%p1780_p4)
}
  0x2c   :  { %s1784_s11 = scalar_lea.vmem %s27_s30, 4096  ;;  %p1789_p6 = scmp.lt.s32.totalorder %s27_s30, %s27_s30 }
  0x2d   :  { %p1785_p5 = scmp.ne.s32.totalorder %s27_s30, %s1784_s11  ;;  %p1790_p7 = scmp.lt.s32.totalorder %s1784_s11, %s1784_s11 }
  0x2f   :  { %p1791_p8 = por %p1790_p7, %p1789_p6 }
  0x31   :  { %p1792_p9 = pnand %p1791_p8, %p1785_p5 }
  0x33   :  { %1795 = shalt.err (!%p1792_p9)
}
  0x34   :  { %s1899_s5 = smov 256   ;;  %s1900_s28 = smov 16  }
  0x35   :  { %32 = dma.hbm_to_vmem [thread:$0]  %s2149_s0, 4096, %s27_s30, [#allocation3], %s1899_s5, %s1899_s5, %s1900_s28  }
  0x36   :  { %s1901_s15 = smov [#allocation7]   ;;  %s1902_s17 = smov [#allocation10]  }
  0x37   :  { %s52_s16 = sshll.u32 %s1901_s15, 4  ;;  %s80_s18 = sshll.u32 %s1902_s17, 4  ;;  %s53_s16 = int_to_ptr.vmem [resolvable:$true] %s52_s16  ;;  %s81_s18 = int_to_ptr.vmem [resolvable:$true] %s80_s18 }
  0x38   :  { %s1796_s19 = scalar_lea.hbm %s2152_s3, 1024 }
  0x39   :  { %p1797_p10 = scmp.ne.s32.totalorder %s2152_s3, %s1796_s19  ;;  %p1800_p11 = scmp.lt.u32.totalorder %s1796_s19, %s2152_s3 }
  0x3b   :  { %p1802_p12 = pnand %p1800_p11, %p1797_p10 }
  0x3d   :  { %1805 = shalt.err (!%p1802_p12)
}
  0x3e   :  { %s1806_s0 = scalar_lea.vmem %s53_s16, 1024  ;;  %p1811_p0 = scmp.lt.s32.totalorder %s53_s16, %s53_s16 }
  0x3f   :  { %p1807_p13 = scmp.ne.s32.totalorder %s53_s16, %s1806_s0  ;;  %p1812_p1 = scmp.lt.s32.totalorder %s1806_s0, %s1806_s0 }
  0x41   :  { %p1813_p2 = por %p1812_p1, %p1811_p0 }
  0x43   :  { %p1814_p3 = pnand %p1813_p2, %p1807_p13 }
  0x45   :  { %1817 = shalt.err (!%p1814_p3)
}
  0x46   :  { %58 = dma.hbm_to_vmem [thread:$0]  %s2152_s3, 1024, %s53_s16, [#allocation6], %s1895_s23, %s1895_s23, %s1896_s24  }
  0x47   :  { %s1818_s11 = scalar_lea.hbm %s2156_s7, 2048 }
  0x48   :  { %p1819_p4 = scmp.ne.s32.totalorder %s2156_s7, %s1818_s11  ;;  %p1822_p5 = scmp.lt.u32.totalorder %s1818_s11, %s2156_s7 }
  0x4a   :  { %p1824_p6 = pnand %p1822_p5, %p1819_p4 }
  0x4c   :  { %1827 = shalt.err (!%p1824_p6)
}
  0x4d   :  { %s1828_s1 = scalar_lea.vmem %s81_s18, 2048  ;;  %p1833_p8 = scmp.lt.s32.totalorder %s81_s18, %s81_s18 }
  0x4e   :  { %p1829_p7 = scmp.ne.s32.totalorder %s81_s18, %s1828_s1  ;;  %p1834_p9 = scmp.lt.s32.totalorder %s1828_s1, %s1828_s1 }
  0x50   :  { %p1835_p10 = por %p1834_p9, %p1833_p8 }
  0x52   :  { %p1836_p11 = pnand %p1835_p10, %p1829_p7 }
  0x54   :  { %1839 = shalt.err (!%p1836_p11)
}
  0x55   :  { %s1903_s3 = smov 128   ;;  %s1904_s23 = smov 8  }
  0x56   :  { %86 = dma.hbm_to_vmem [thread:$0]  %s2156_s7, 2048, %s81_s18, [#allocation9], %s1903_s3, %s1903_s3, %s1904_s23  }
  0x57   :  { %1884 = dma.done.wait [#allocation3], 4096  }
  0x58   :  { %1885 = vsyncadd [#allocation3], 4294963200 }
  0x59   :  { %1886 = dma.done.wait [#allocation6], 3072  }
  0x5a   :  { %1887 = vsyncadd [#allocation6], 4294964224 }
  0x5b   :  { %1888 = dma.done.wait [#allocation9], 3072  }
  0x5c   :  { %1889 = vsyncadd [#allocation9], 4294964224  ;;  %v1546_v0 = vld [vmem:[#allocation5 + $0x40] sm:$0xff]   ;;  %v1548_v2 = vld [vmem:[#allocation5 + $0x48] sm:$0xff]  }
  0x5d   :  { %v1547_v1 = vld [vmem:[#allocation5] sm:$0xff]   ;;  %1356 = vmatprep.subr.bf16.mxu0 %v1546_v0  ;;  %1516 = vmatprep.subr.bf16.mxu1 %v1546_v0  ;;  %v1549_v3 = vld [vmem:[#allocation5 + $0x8] sm:$0xff]   ;;  %v1550_v4 = vld [vmem:[#allocation5 + $0x50] sm:$0xff]  }
  0x5e   :  { %1357 = vmatpush3.bf16.msra.mxu0 %v1547_v1  ;;  %1524 = vmatpush3.bf16.msra.mxu1 %v1547_v1  ;;  %v1551_v5 = vld [vmem:[#allocation5 + $0x10] sm:$0xff]   ;;  %v1552_v6 = vld [vmem:[#allocation5 + $0x58] sm:$0xff]   ;;  %v1554_v8 = vld [vmem:[#allocation5 + $0x60] sm:$0xff]  }
  0x5f   :  { %1358 = vmatprep.subr.bf16.mxu0 %v1548_v2  ;;  %1517 = vmatprep.subr.bf16.mxu1 %v1548_v2  ;;  %v1553_v7 = vld [vmem:[#allocation5 + $0x18] sm:$0xff]   ;;  %v1555_v9 = vld [vmem:[#allocation5 + $0x20] sm:$0xff]   ;;  %v1556_v10 = vld [vmem:[#allocation5 + $0x68] sm:$0xff]  }
  0x60   :  { %v110_v11 = vld [vmem:[#allocation2 + $0x8] sm:$0xff]  ;;  %v112_v12 = vld [vmem:[#allocation2 + $0x18] sm:$0xff]  ;;  %v1558_v15 = vld [vmem:[#allocation5 + $0x70] sm:$0xff]  }
  0x61   :  { %v142_v13 = vpack.c.bf16 %v112_v12, %v110_v11  ;;  %v1557_v14 = vld [vmem:[#allocation5 + $0x28] sm:$0xff]   ;;  %v128_v17 = vld [vmem:[#allocation2 + $0x98] sm:$0xff]  ;;  %v1559_v19 = vld [vmem:[#allocation5 + $0x30] sm:$0xff]  }
  0x62   :  { %1359 = vmatpush3.bf16.msra.mxu0 %v1549_v3  ;;  %1525 = vmatpush3.bf16.msra.mxu1 %v1549_v3  ;;  %v126_v16 = vld [vmem:[#allocation2 + $0x88] sm:$0xff]  ;;  %v1560_v20 = vld [vmem:[#allocation5 + $0x78] sm:$0xff]   ;;  %v109_v22 = vld [vmem:[#allocation2] sm:$0xff] }
  0x63   :  { %1360 = vmatprep.subr.bf16.mxu0 %v1550_v4  ;;  %1518 = vmatprep.subr.bf16.mxu1 %v1550_v4  ;;  %v150_v18 = vpack.c.bf16 %v128_v17, %v126_v16  ;;  %v1561_v21 = vld [vmem:[#allocation5 + $0x38] sm:$0xff]   ;;  %v111_v23 = vld [vmem:[#allocation2 + $0x10] sm:$0xff]  ;;  %v114_v24 = vld [vmem:[#allocation2 + $0x28] sm:$0xff] }
  0x64   :  { %323 = vmatprep.mubr.bf16.mxu0 %v142_v13  ;;  %v116_v25 = vld [vmem:[#allocation2 + $0x38] sm:$0xff]  ;;  %v125_v26 = vld [vmem:[#allocation2 + $0x80] sm:$0xff]  ;;  %v127_v27 = vld [vmem:[#allocation2 + $0x90] sm:$0xff]  ;;  %v141_v31 = vpack.c.bf16 %v111_v23, %v109_v22 }
  0x65   :  { %355 = vmatprep.mubr.bf16.mxu1 %v150_v18  ;;  %v130_v28 = vld [vmem:[#allocation2 + $0xa8] sm:$0xff]  ;;  %v132_v29 = vld [vmem:[#allocation2 + $0xb8] sm:$0xff]  ;;  %v1562_v30 = vld [vmem:[#allocation7] sm:$0xff]   ;;  %v144_v32 = vpack.c.bf16 %v116_v25, %v114_v24  ;;  %v149_v33 = vpack.c.bf16 %v127_v27, %v125_v26 }
  0x66   :  { %1361 = vmatpush3.bf16.msra.mxu0 %v1551_v5  ;;  %1526 = vmatpush3.bf16.msra.mxu1 %v1551_v5  ;;  %v1563_v34 = vld [vmem:[#allocation7 + $0x8] sm:$0xff]   ;;  %v152_v35 = vpack.c.bf16 %v132_v29, %v130_v28  ;;  %v113_v36 = vld [vmem:[#allocation2 + $0x20] sm:$0xff]  ;;  %v115_v37 = vld [vmem:[#allocation2 + $0x30] sm:$0xff] }
  0x67   :  { %1362 = vmatprep.subr.bf16.mxu0 %v1552_v6  ;;  %1519 = vmatprep.subr.bf16.mxu1 %v1552_v6  ;;  %v118_v38 = vld [vmem:[#allocation2 + $0x48] sm:$0xff]  ;;  %v120_v39 = vld [vmem:[#allocation2 + $0x58] sm:$0xff]  ;;  %v129_v40 = vld [vmem:[#allocation2 + $0xa0] sm:$0xff]  ;;  %v143_v45 = vpack.c.bf16 %v115_v37, %v113_v36 }
  0x68   :  { %v131_v41 = vld [vmem:[#allocation2 + $0xb0] sm:$0xff]  ;;  %v134_v42 = vld [vmem:[#allocation2 + $0xc8] sm:$0xff]  ;;  %v136_v43 = vld [vmem:[#allocation2 + $0xd8] sm:$0xff]  ;;  %v146_v46 = vpack.c.bf16 %v120_v39, %v118_v38 }
  0x69   :  { %v1564_v44 = vld [vmem:[#allocation7 + $0x10] sm:$0xff]   ;;  %v151_v47 = vpack.c.bf16 %v131_v41, %v129_v40  ;;  %v1565_v48 = vld [vmem:[#allocation7 + $0x18] sm:$0xff]   ;;  %v154_v49 = vpack.c.bf16 %v136_v43, %v134_v42  ;;  %v117_v50 = vld [vmem:[#allocation2 + $0x40] sm:$0xff] }
  0x6a   :  { %1363 = vmatpush3.bf16.msra.mxu0 %v1553_v7  ;;  %1527 = vmatpush3.bf16.msra.mxu1 %v1553_v7  ;;  %v119_v51 = vld [vmem:[#allocation2 + $0x50] sm:$0xff]  ;;  %v122_v52 = vld [vmem:[#allocation2 + $0x68] sm:$0xff]  ;;  %v124_v53 = vld [vmem:[#allocation2 + $0x78] sm:$0xff] }
  0x6b   :  { %1364 = vmatprep.subr.bf16.mxu0 %v1554_v8  ;;  %1520 = vmatprep.subr.bf16.mxu1 %v1554_v8  ;;  %v133_v54 = vld [vmem:[#allocation2 + $0xc0] sm:$0xff]  ;;  %v135_v55 = vld [vmem:[#allocation2 + $0xd0] sm:$0xff]  ;;  %v138_v56 = vld [vmem:[#allocation2 + $0xe8] sm:$0xff]  ;;  %v145_v58 = vpack.c.bf16 %v119_v51, %v117_v50  ;;  %v148_v59 = vpack.c.bf16 %v124_v53, %v122_v52 }
  0x6c   :  { %v140_v57 = vld [vmem:[#allocation2 + $0xf8] sm:$0xff]  ;;  %v153_v60 = vpack.c.bf16 %v135_v55, %v133_v54  ;;  %v121_v62 = vld [vmem:[#allocation2 + $0x60] sm:$0xff]  ;;  %v123_v63 = vld [vmem:[#allocation2 + $0x70] sm:$0xff] }
  0x6d   :  { %v156_v61 = vpack.c.bf16 %v140_v57, %v138_v56  ;;  %v137_v0 = vld [vmem:[#allocation2 + $0xe0] sm:$0xff]  ;;  %v139_v1 = vld [vmem:[#allocation2 + $0xf0] sm:$0xff]  ;;  %v147_v2 = vpack.c.bf16 %v123_v63, %v121_v62  ;;  %v1567_v5 = vld [vmem:[#allocation7 + $0x28] sm:$0xff]  }
  0x6e   :  { %1365 = vmatpush3.bf16.msra.mxu0 %v1555_v9  ;;  %1528 = vmatpush3.bf16.msra.mxu1 %v1555_v9  ;;  %v155_v3 = vpack.c.bf16 %v139_v1, %v137_v0  ;;  %v1566_v4 = vld [vmem:[#allocation7 + $0x20] sm:$0xff]   ;;  %v1568_v6 = vld [vmem:[#allocation7 + $0x30] sm:$0xff]   ;;  %v1569_v7 = vld [vmem:[#allocation7 + $0x38] sm:$0xff]  }
  0x6f   :  { %1366 = vmatprep.subr.bf16.mxu0 %v1556_v10  ;;  %1521 = vmatprep.subr.bf16.mxu1 %v1556_v10  ;;  %v2038_v8 = vld [vmem:[#allocation8] sm:$0xff]  }
  0x70   :  { %v2044_v10 = vld [vmem:[%s2151_s2] ss:$0 sm:$0xff] }
  0x72   :  { %1367 = vmatpush3.bf16.msra.mxu0 %v1557_v14  ;;  %1529 = vmatpush3.bf16.msra.mxu1 %v1557_v14 }
  0x73   :  { %1368 = vmatprep.subr.bf16.mxu0 %v1558_v15  ;;  %1522 = vmatprep.subr.bf16.mxu1 %v1558_v15 }
  0x76   :  { %1369 = vmatpush3.bf16.msra.mxu0 %v1559_v19  ;;  %1530 = vmatpush3.bf16.msra.mxu1 %v1559_v19 }
  0x77   :  { %1370 = vmatprep.subr.bf16.mxu0 %v1560_v20  ;;  %1523 = vmatprep.subr.bf16.mxu1 %v1560_v20 }
  0x7a   :  { %1371 = vmatpush3.bf16.msra.mxu0 %v1561_v21  ;;  %1531 = vmatpush3.bf16.msra.mxu1 %v1561_v21 }
  0x7b   :  { %1452 = vmatprep.subr.bf16.mxu1 %v1562_v30 }
  0x7d   :  { %324 = vmatmul.mubr.bf16.vlgmr.msra.gmra.mrb[0].mxu0 %v141_v31  ;;  %356 = vmatmul.mubr.bf16.vlgmr.msra.gmra.mrb[0].mxu1 %v149_v33 }
  0x7e   :  { %331 = vmatprep.mubr.bf16.mxu0 %v144_v32  ;;  %363 = vmatprep.mubr.bf16.mxu1 %v152_v35 }
  0x7f   :  { %1453 = vmatpush3.bf16.msra.mxu1 %v1562_v30 }
  0x80   :  { %1454 = vmatprep.subr.bf16.mxu1 %v1563_v34 }
  0x83   :  { %1455 = vmatpush3.bf16.msra.mxu1 %v1563_v34 }
  0x84   :  { %1456 = vmatprep.subr.bf16.mxu1 %v1564_v44 }
  0x85   :  { %332 = vmatmul.mubr.bf16.gmra.mrb[4].mxu0 %v143_v45  ;;  %364 = vmatmul.mubr.bf16.gmra.mrb[4].mxu1 %v151_v47 }
  0x86   :  { %339 = vmatprep.mubr.bf16.mxu0 %v146_v46  ;;  %371 = vmatprep.mubr.bf16.mxu1 %v154_v49 }
  0x87   :  { %1457 = vmatpush3.bf16.msra.mxu1 %v1564_v44 }
  0x88   :  { %1458 = vmatprep.subr.bf16.mxu1 %v1565_v48 }
  0x8b   :  { %1459 = vmatpush3.bf16.msra.mxu1 %v1565_v48 }
  0x8c   :  { %1460 = vmatprep.subr.bf16.mxu1 %v1566_v4 }
  0x8d   :  { %340 = vmatmul.mubr.bf16.gmra.mrb[8].mxu0 %v145_v58  ;;  %372 = vmatmul.mubr.bf16.gmra.mrb[8].mxu1 %v153_v60 }
  0x8e   :  { %347 = vmatprep.mubr.bf16.mxu0 %v148_v59  ;;  %379 = vmatprep.mubr.bf16.mxu1 %v156_v61  ;;  %v1571_v59 = vld [vmem:[#allocation8 + $0x8] sm:$0xff]  }
  0x8f   :  { %1461 = vmatpush3.bf16.msra.mxu1 %v1566_v4 }
  0x90   :  { %1462 = vmatprep.subr.bf16.mxu1 %v1567_v5 }
  0x93   :  { %1463 = vmatpush3.bf16.msra.mxu1 %v1567_v5 }
  0x94   :  { %1464 = vmatprep.subr.bf16.mxu1 %v1568_v6 }
  0x95   :  { %348 = vmatmul.mubr.bf16.gmra.mrb[12].mxu0 %v147_v2  ;;  %380 = vmatmul.mubr.bf16.gmra.mrb[12].mxu1 %v155_v3 }
  0x97   :  { %1465 = vmatpush3.bf16.msra.mxu1 %v1568_v6  ;;  %v1572_v6 = vld [vmem:[#allocation8 + $0x10] sm:$0xff]  }
  0x98   :  { %1466 = vmatprep.subr.bf16.mxu1 %v1569_v7 }
  0x9b   :  { %1467 = vmatpush3.bf16.msra.mxu1 %v1569_v7 }
  0x9c   :  { %1484 = vmatprep.subr.bf16.mxu1 %v2038_v8 }
 0x150   :  { %v1372_v9 = vpop.f32.mrb[0].mxu0  ;;  %v1396_v12 = vpop.f32.mrb[0].mxu1 }
 0x151   :  { %v1373_v11 = vpop.f32.mrb[1].mxu0  ;;  %v1397_v15 = vpop.f32.mrb[1].mxu1 }
 0x152   :  { %v1374_v13 = vadd.f32 %v1373_v11, %v1372_v9  ;;  %v1375_v14 = vpop.f32.mrb[2].mxu0  ;;  %v1398_v17 = vadd.f32 %v1397_v15, %v1396_v12  ;;  %v1399_v18 = vpop.f32.mrb[2].mxu1 }
 0x153   :  { %v1376_v16 = vpop.f32.mrb[3].mxu0  ;;  %v1400_v21 = vpop.f32.mrb[3].mxu1 }
 0x154   :  { %v326_v19 = vadd.f32 %v1374_v13, %v2044_v10  ;;  %v1377_v20 = vadd.f32 %v1376_v16, %v1375_v14  ;;  %v358_v22 = vadd.f32 %v1398_v17, %v2044_v10  ;;  %v1401_v23 = vadd.f32 %v1400_v21, %v1399_v18 }
 0x156   :  { %v329_v24 = vadd.f32 %v1377_v20, %v2044_v10  ;;  %v396_v25 = vmax.f32 %v358_v22, 0.0  ;;  %v361_v26 = vadd.f32 %v1401_v23, %v2044_v10  ;;  %v388_v27 = vmax.f32 %v326_v19, 0.0 }
 0x158   :  { %v389_v28 = vmax.f32 %v329_v24, 0.0  ;;  %v1378_v29 = vpop.f32.mrb[4].mxu0  ;;  %v397_v31 = vmax.f32 %v361_v26, 0.0  ;;  %v1402_v32 = vpop.f32.mrb[4].mxu1 }
 0x159   :  { %v1379_v30 = vpop.f32.mrb[5].mxu0  ;;  %v1403_v36 = vpop.f32.mrb[5].mxu1 }
 0x15a   :  { %v1380_v33 = vadd.f32 %v1379_v30, %v1378_v29  ;;  %v1381_v34 = vpop.f32.mrb[6].mxu0  ;;  %v404_v35 = vpack.c.bf16 %v389_v28, %v388_v27  ;;  %v1404_v38 = vadd.f32 %v1403_v36, %v1402_v32  ;;  %v1405_v39 = vpop.f32.mrb[6].mxu1  ;;  %v2050_v40 = vpack.c.bf16 %v397_v31, %v396_v25  ;;  %v1574_v31 = vld [vmem:[#allocation8 + $0x20] sm:$0xff]  }
 0x15b   :  { %v1382_v37 = vpop.f32.mrb[7].mxu0  ;;  %v1406_v43 = vpop.f32.mrb[7].mxu1 }
 0x15c   :  { %v334_v41 = vadd.f32 %v1380_v33, %v2044_v10  ;;  %v1383_v42 = vadd.f32 %v1382_v37, %v1381_v34  ;;  %1468 = vmatprep.mubr.bf16.mxu1 %v404_v35  ;;  %v366_v44 = vadd.f32 %v1404_v38, %v2044_v10  ;;  %v1407_v45 = vadd.f32 %v1406_v43, %v1405_v39  ;;  %v1575_v38 = vld [vmem:[#allocation8 + $0x28] sm:$0xff]  }
 0x15d   :  { %v1580_v43 = vld [vmem:[#allocation10 + $0x4] ss:$8 sps:$4 sm:$0xff]  }
 0x15e   :  { %v337_v46 = vadd.f32 %v1383_v42, %v2044_v10  ;;  %v398_v47 = vmax.f32 %v366_v44, 0.0  ;;  %v369_v48 = vadd.f32 %v1407_v45, %v2044_v10  ;;  %v390_v49 = vmax.f32 %v334_v41, 0.0  ;;  %v1576_v41 = vld [vmem:[#allocation8 + $0x30] sm:$0xff]   ;;  %v1578_v42 = vld [vmem:[#allocation10] ss:$8 sps:$4 sm:$0xff]   ;;  %885 = vmatprep.subr.bf16.mxu0 %v1580_v43 }
 0x15f   :  { %v1583_v44 = vld [vmem:[#allocation10 + $0x14] ss:$8 sps:$4 sm:$0xff]   ;;  %886 = vmatpush1.bf16.msra.mxu0 %v1578_v42  ;;  %v1581_v45 = vld [vmem:[#allocation10 + $0x10] ss:$8 sps:$4 sm:$0xff]  }
 0x160   :  { %v391_v50 = vmax.f32 %v337_v46, 0.0  ;;  %v1384_v51 = vpop.f32.mrb[8].mxu0  ;;  %v399_v53 = vmax.f32 %v369_v48, 0.0  ;;  %v1408_v54 = vpop.f32.mrb[8].mxu1  ;;  %887 = vmatprep.subr.bf16.mxu0 %v1583_v44  ;;  %v1584_v46 = vld [vmem:[#allocation10 + $0x20] ss:$8 sps:$4 sm:$0xff]  }
 0x161   :  { %v1385_v52 = vpop.f32.mrb[9].mxu0  ;;  %v1409_v58 = vpop.f32.mrb[9].mxu1  ;;  %v1587_v48 = vld [vmem:[#allocation10 + $0x30] ss:$8 sps:$4 sm:$0xff]  }
 0x162   :  { %v405_v55 = vpack.c.bf16 %v391_v50, %v390_v49  ;;  %v1386_v56 = vadd.f32 %v1385_v52, %v1384_v51  ;;  %v1387_v57 = vpop.f32.mrb[10].mxu0  ;;  %v1410_v61 = vadd.f32 %v1409_v58, %v1408_v54  ;;  %v1411_v62 = vpop.f32.mrb[10].mxu1  ;;  %v409_v63 = vpack.c.bf16 %v399_v53, %v398_v47  ;;  %v1589_v47 = vld [vmem:[#allocation10 + $0x34] ss:$8 sps:$4 sm:$0xff]   ;;  %v1592_v49 = vld [vmem:[#allocation10 + $0x44] ss:$8 sps:$4 sm:$0xff]  }
 0x163   :  { %v1388_v60 = vpop.f32.mrb[11].mxu0  ;;  %v1412_v2 = vpop.f32.mrb[11].mxu1  ;;  %888 = vmatpush1.bf16.msra.mxu0 %v1581_v45  ;;  %v1590_v50 = vld [vmem:[#allocation10 + $0x40] ss:$8 sps:$4 sm:$0xff]   ;;  %v1595_v51 = vld [vmem:[#allocation10 + $0x54] ss:$8 sps:$4 sm:$0xff]  }
 0x164   :  { %v342_v0 = vadd.f32 %v1386_v56, %v2044_v10  ;;  %v1389_v1 = vadd.f32 %v1388_v60, %v1387_v57  ;;  %1469 = vmatmul.mubr.bf16.vlgmr.msra.gmra.mrb[16].mxu1 %v405_v55  ;;  %v374_v3 = vadd.f32 %v1410_v61, %v2044_v10  ;;  %v1413_v4 = vadd.f32 %v1412_v2, %v1411_v62  ;;  %v1593_v52 = vld [vmem:[#allocation10 + $0x50] ss:$8 sps:$4 sm:$0xff]   ;;  %v1290_v53 = vld [vmem:[%s2153_s4] ss:$0 sm:$0xff] }
 0x165   :  { %1485 = vmatpush3.bf16.msra.mxu1 %v2038_v8  ;;  %v1573_v8 = vld [vmem:[#allocation8 + $0x18] sm:$0xff]  }
 0x166   :  { %v345_v5 = vadd.f32 %v1389_v1, %v2044_v10  ;;  %1486 = vmatprep.subr.bf16.mxu1 %v1571_v59  ;;  %v400_v7 = vmax.f32 %v374_v3, 0.0  ;;  %v377_v9 = vadd.f32 %v1413_v4, %v2044_v10  ;;  %v392_v11 = vmax.f32 %v342_v0, 0.0 }
 0x168   :  { %v393_v12 = vmax.f32 %v345_v5, 0.0  ;;  %v1390_v13 = vpop.f32.mrb[12].mxu0  ;;  %v401_v15 = vmax.f32 %v377_v9, 0.0  ;;  %v1414_v16 = vpop.f32.mrb[12].mxu1 }
 0x169   :  { %v1391_v14 = vpop.f32.mrb[13].mxu0  ;;  %1487 = vmatpush3.bf16.msra.mxu1 %v1571_v59  ;;  %v1415_v20 = vpop.f32.mrb[13].mxu1 }
 0x16a   :  { %v1392_v17 = vadd.f32 %v1391_v14, %v1390_v13  ;;  %v1393_v18 = vpop.f32.mrb[14].mxu0  ;;  %v406_v19 = vpack.c.bf16 %v393_v12, %v392_v11  ;;  %1488 = vmatprep.subr.bf16.mxu1 %v1572_v6  ;;  %v1416_v22 = vadd.f32 %v1415_v20, %v1414_v16  ;;  %v1417_v23 = vpop.f32.mrb[14].mxu1  ;;  %v410_v24 = vpack.c.bf16 %v401_v15, %v400_v7 }
 0x16b   :  { %v1394_v21 = vpop.f32.mrb[15].mxu0  ;;  %v1418_v27 = vpop.f32.mrb[15].mxu1 }
 0x16c   :  { %v350_v25 = vadd.f32 %v1392_v17, %v2044_v10  ;;  %v1395_v26 = vadd.f32 %v1394_v21, %v1393_v18  ;;  %1472 = vmatprep.mubr.bf16.mxu1 %v406_v19  ;;  %v382_v28 = vadd.f32 %v1416_v22, %v2044_v10  ;;  %v1419_v29 = vadd.f32 %v1418_v27, %v1417_v23 }
 0x16d   :  { %1489 = vmatpush3.bf16.msra.mxu1 %v1572_v6 }
 0x16e   :  { %v353_v30 = vadd.f32 %v1395_v26, %v2044_v10  ;;  %1490 = vmatprep.subr.bf16.mxu1 %v1573_v8  ;;  %v402_v32 = vmax.f32 %v382_v28, 0.0  ;;  %v385_v33 = vadd.f32 %v1419_v29, %v2044_v10  ;;  %v394_v34 = vmax.f32 %v350_v25, 0.0  ;;  %v1577_v10 = vld [vmem:[#allocation8 + $0x38] sm:$0xff]  }
 0x170   :  { %v395_v35 = vmax.f32 %v353_v30, 0.0  ;;  %v403_v36 = vmax.f32 %v385_v33, 0.0  ;;  %v1601_v33 = vld [vmem:[#allocation10 + $0x74] ss:$8 sps:$4 sm:$0xff]  }
 0x171   :  { %1491 = vmatpush3.bf16.msra.mxu1 %v1573_v8 }
 0x172   :  { %v407_v37 = vpack.c.bf16 %v395_v35, %v394_v34  ;;  %1492 = vmatprep.subr.bf16.mxu1 %v1574_v31  ;;  %v411_v39 = vpack.c.bf16 %v403_v36, %v402_v32  ;;  %v1596_v32 = vld [vmem:[#allocation10 + $0x60] ss:$8 sps:$4 sm:$0xff]   ;;  %v1599_v34 = vld [vmem:[#allocation10 + $0x70] ss:$8 sps:$4 sm:$0xff]   ;;  %v1905_v35 = vmov 0  }
 0x173   :  { %917 = vmatprep.mubr.bf16.mxu0 %v1905_v35  ;;  %v1299_v36 = vld [vmem:[%s2155_s6] ss:$0 sm:$0xff]  ;;  %s1906_s6 = smov [#allocation11]  }
 0x174   :  { %1473 = vmatmul.mubr.bf16.gmra.mrb[20].mxu1 %v407_v37  ;;  %s1243_s20 = sshll.u32 %s1906_s6, 4  ;;  %s1244_s20 = int_to_ptr.vmem [resolvable:$true] %s1243_s20 }
 0x175   :  { %1476 = vmatprep.mubr.bf16.mxu1 %v2050_v40  ;;  %1493 = vmatpush3.bf16.msra.mxu1 %v1574_v31  ;;  %v1586_v40 = vld [vmem:[#allocation10 + $0x24] ss:$8 sps:$4 sm:$0xff]   ;;  %s1840_s21 = scalar_lea.vmem %s1244_s20, 2048  ;;  %p1845_p13 = scmp.lt.s32.totalorder %s1244_s20, %s1244_s20 }
 0x176   :  { %1494 = vmatprep.subr.bf16.mxu1 %v1575_v38  ;;  %889 = vmatprep.subr.bf16.mxu0 %v1586_v40  ;;  %v1598_v31 = vld [vmem:[#allocation10 + $0x64] ss:$8 sps:$4 sm:$0xff]   ;;  %p1841_p12 = scmp.ne.s32.totalorder %s1244_s20, %s1840_s21  ;;  %p1846_p0 = scmp.lt.s32.totalorder %s1840_s21, %s1840_s21 }
 0x177   :  { %890 = vmatpush1.bf16.msra.mxu0 %v1584_v46 }
 0x178   :  { %891 = vmatprep.subr.bf16.mxu0 %v1589_v47  ;;  %p1847_p1 = por %p1846_p0, %p1845_p13 }
 0x179   :  { %1495 = vmatpush3.bf16.msra.mxu1 %v1575_v38 }
 0x17a   :  { %1496 = vmatprep.subr.bf16.mxu1 %v1576_v41  ;;  %p1848_p2 = pnand %p1847_p1, %p1841_p12 }
 0x17b   :  { %892 = vmatpush1.bf16.msra.mxu0 %v1587_v48 }
 0x17c   :  { %1477 = vmatmul.mubr.bf16.gmra.mrb[24].mxu1 %v409_v63  ;;  %893 = vmatprep.subr.bf16.mxu0 %v1592_v49 }
 0x17d   :  { %1480 = vmatprep.mubr.bf16.mxu1 %v410_v24  ;;  %1497 = vmatpush3.bf16.msra.mxu1 %v1576_v41 }
 0x17e   :  { %1498 = vmatprep.subr.bf16.mxu1 %v1577_v10 }
 0x17f   :  { %894 = vmatpush1.bf16.msra.mxu0 %v1590_v50 }
 0x180   :  { %895 = vmatprep.subr.bf16.mxu0 %v1595_v51 }
 0x181   :  { %1499 = vmatpush3.bf16.msra.mxu1 %v1577_v10 }
 0x183   :  { %896 = vmatpush1.bf16.msra.mxu0 %v1593_v52 }
 0x184   :  { %1481 = vmatmul.mubr.bf16.gmra.mrb[28].mxu1 %v411_v39  ;;  %897 = vmatprep.subr.bf16.mxu0 %v1598_v31 }
 0x187   :  { %898 = vmatpush1.bf16.msra.mxu0 %v1596_v32 }
 0x188   :  { %899 = vmatprep.subr.bf16.mxu0 %v1601_v33 }
 0x18b   :  { %900 = vmatpush1.bf16.msra.mxu0 %v1599_v34 }
 0x237   :  { %v1470_v54 = vpop.f32.mrb[16].mxu1 }
 0x238   :  { %v525_v55 = vadd.f32 %v1470_v54, %v1290_v53  ;;  %v516_v56 = vpop.f32.mrb[17].mxu1 }
 0x239   :  { %v517_v57 = vadd.f32 %v1290_v53, %v516_v56  ;;  %v1471_v58 = vpop.f32.mrb[18].mxu1 }
 0x23a   :  { %1192 = vst [vmem:[#allocation11 + $0x10] sm:$0xff] %v525_v55  ;;  %v528_v59 = vadd.f32 %v1471_v58, %v1290_v53  ;;  %v519_v60 = vpop.f32.mrb[19].mxu1 }
 0x23b   :  { %1190 = vst [vmem:[#allocation11] sm:$0xff] %v517_v57  ;;  %v520_v61 = vadd.f32 %v1290_v53, %v519_v60 }
 0x23c   :  { %v580_v62 = vpack.c.bf16 %v528_v59, %v525_v55  ;;  %1193 = vst [vmem:[#allocation11 + $0x18] sm:$0xff] %v528_v59 }
 0x23d   :  { %v579_v63 = vpack.c.bf16 %v520_v61, %v517_v57  ;;  %1191 = vst [vmem:[#allocation11 + $0x8] sm:$0xff] %v520_v61 }
 0x23f   :  { %1500 = vmatprep.mubr.bf16.mxu1 %v579_v63 }
 0x240   :  { %1501 = vmatmul.mubr.bf16.vlgmr.msra.gmra.mrb[32].mxu1 %v580_v62 }
 0x247   :  { %v1474_v0 = vpop.f32.mrb[20].mxu1 }
 0x248   :  { %v541_v1 = vadd.f32 %v1474_v0, %v1290_v53  ;;  %v532_v2 = vpop.f32.mrb[21].mxu1 }
 0x249   :  { %v533_v3 = vadd.f32 %v1290_v53, %v532_v2  ;;  %v1475_v4 = vpop.f32.mrb[22].mxu1 }
 0x24a   :  { %1196 = vst [vmem:[#allocation11 + $0x30] sm:$0xff] %v541_v1  ;;  %v544_v5 = vadd.f32 %v1475_v4, %v1290_v53  ;;  %v535_v6 = vpop.f32.mrb[23].mxu1 }
 0x24b   :  { %1194 = vst [vmem:[#allocation11 + $0x20] sm:$0xff] %v533_v3  ;;  %v536_v7 = vadd.f32 %v1290_v53, %v535_v6 }
 0x24c   :  { %v582_v9 = vpack.c.bf16 %v544_v5, %v541_v1  ;;  %1197 = vst [vmem:[#allocation11 + $0x38] sm:$0xff] %v544_v5 }
 0x24d   :  { %v581_v11 = vpack.c.bf16 %v536_v7, %v533_v3  ;;  %1195 = vst [vmem:[#allocation11 + $0x28] sm:$0xff] %v536_v7 }
 0x24f   :  { %v1478_v12 = vpop.f32.mrb[24].mxu1  ;;  %1504 = vmatprep.mubr.bf16.mxu1 %v581_v11 }
 0x250   :  { %v557_v13 = vadd.f32 %v1478_v12, %v1290_v53  ;;  %v548_v14 = vpop.f32.mrb[25].mxu1  ;;  %1505 = vmatmul.mubr.bf16.gmra.mrb[36].mxu1 %v582_v9 }
 0x251   :  { %v549_v15 = vadd.f32 %v1290_v53, %v548_v14  ;;  %v1479_v16 = vpop.f32.mrb[26].mxu1 }
 0x252   :  { %1200 = vst [vmem:[#allocation11 + $0x50] sm:$0xff] %v557_v13  ;;  %v560_v17 = vadd.f32 %v1479_v16, %v1290_v53  ;;  %v551_v18 = vpop.f32.mrb[27].mxu1 }
 0x253   :  { %1198 = vst [vmem:[#allocation11 + $0x40] sm:$0xff] %v549_v15  ;;  %v552_v19 = vadd.f32 %v1290_v53, %v551_v18 }
 0x254   :  { %v584_v20 = vpack.c.bf16 %v560_v17, %v557_v13  ;;  %1201 = vst [vmem:[#allocation11 + $0x58] sm:$0xff] %v560_v17 }
 0x255   :  { %v583_v8 = vpack.c.bf16 %v552_v19, %v549_v15  ;;  %1199 = vst [vmem:[#allocation11 + $0x48] sm:$0xff] %v552_v19 }
 0x257   :  { %1508 = vmatprep.mubr.bf16.mxu1 %v583_v8  ;;  %v1482_v21 = vpop.f32.mrb[28].mxu1 }
 0x258   :  { %1509 = vmatmul.mubr.bf16.gmra.mrb[40].mxu1 %v584_v20  ;;  %v573_v22 = vadd.f32 %v1482_v21, %v1290_v53  ;;  %v564_v23 = vpop.f32.mrb[29].mxu1 }
 0x259   :  { %v565_v24 = vadd.f32 %v1290_v53, %v564_v23  ;;  %v1483_v25 = vpop.f32.mrb[30].mxu1 }
 0x25a   :  { %1204 = vst [vmem:[#allocation11 + $0x70] sm:$0xff] %v573_v22  ;;  %v576_v26 = vadd.f32 %v1483_v25, %v1290_v53  ;;  %v567_v27 = vpop.f32.mrb[31].mxu1 }
 0x25b   :  { %1202 = vst [vmem:[#allocation11 + $0x60] sm:$0xff] %v565_v24  ;;  %v568_v28 = vadd.f32 %v1290_v53, %v567_v27 }
 0x25c   :  { %v586_v29 = vpack.c.bf16 %v576_v26, %v573_v22  ;;  %1205 = vst [vmem:[#allocation11 + $0x78] sm:$0xff] %v576_v26 }
 0x25d   :  { %v585_v30 = vpack.c.bf16 %v568_v28, %v565_v24  ;;  %1203 = vst [vmem:[#allocation11 + $0x68] sm:$0xff] %v568_v28 }
 0x25f   :  { %1512 = vmatprep.mubr.bf16.mxu1 %v585_v30 }
 0x260   :  { %1513 = vmatmul.mubr.bf16.gmra.mrb[44].mxu1 %v586_v29 }
 0x313   :  { %v1502_v37 = vpop.f32.mrb[32].mxu1 }
 0x314   :  { %v700_v38 = vadd.f32 %v1502_v37, %v1299_v36  ;;  %v691_v39 = vpop.f32.mrb[33].mxu1 }
 0x315   :  { %v692_v41 = vadd.f32 %v1299_v36, %v691_v39  ;;  %v1503_v10 = vpop.f32.mrb[34].mxu1 }
 0x316   :  { %v703_v42 = vadd.f32 %v1503_v10, %v1299_v36  ;;  %v694_v43 = vpop.f32.mrb[35].mxu1  ;;  %v756_v45 = vmax.f32 %v700_v38, 0.0 }
 0x317   :  { %v695_v44 = vadd.f32 %v1299_v36, %v694_v43  ;;  %v754_v46 = vmax.f32 %v692_v41, 0.0 }
 0x318   :  { %v757_v40 = vmax.f32 %v703_v42, 0.0 }
 0x319   :  { %v755_v47 = vmax.f32 %v695_v44, 0.0 }
 0x31a   :  { %v771_v48 = vpack.c.bf16 %v757_v40, %v756_v45 }
 0x31b   :  { %v770_v49 = vpack.c.bf16 %v755_v47, %v754_v46 }
 0x31d   :  { %918 = vmatmul.mubr.bf16.vlgmr.msra.gmra.mrb[16].mxu0 %v770_v49 }
 0x31e   :  { %927 = vmatprep.mubr.bf16.mxu0 %v1905_v35 }
 0x323   :  { %v1506_v50 = vpop.f32.mrb[36].mxu1 }
 0x324   :  { %v716_v51 = vadd.f32 %v1506_v50, %v1299_v36  ;;  %v707_v52 = vpop.f32.mrb[37].mxu1 }
 0x325   :  { %v708_v53 = vadd.f32 %v1299_v36, %v707_v52  ;;  %v1507_v54 = vpop.f32.mrb[38].mxu1  ;;  %928 = vmatmul.mubr.bf16.gmra.mrb[20].mxu0 %v771_v48 }
 0x326   :  { %v719_v55 = vadd.f32 %v1507_v54, %v1299_v36  ;;  %v710_v56 = vpop.f32.mrb[39].mxu1  ;;  %937 = vmatprep.mubr.bf16.mxu0 %v1905_v35  ;;  %v760_v58 = vmax.f32 %v716_v51, 0.0 }
 0x327   :  { %v711_v57 = vadd.f32 %v1299_v36, %v710_v56  ;;  %v758_v60 = vmax.f32 %v708_v53, 0.0 }
 0x328   :  { %v761_v59 = vmax.f32 %v719_v55, 0.0 }
 0x329   :  { %v759_v61 = vmax.f32 %v711_v57, 0.0 }
 0x32a   :  { %v773_v62 = vpack.c.bf16 %v761_v59, %v760_v58 }
 0x32b   :  { %v772_v63 = vpack.c.bf16 %v759_v61, %v758_v60  ;;  %v1510_v0 = vpop.f32.mrb[40].mxu1 }
 0x32c   :  { %v732_v1 = vadd.f32 %v1510_v0, %v1299_v36  ;;  %v723_v2 = vpop.f32.mrb[41].mxu1 }
 0x32d   :  { %v724_v3 = vadd.f32 %v1299_v36, %v723_v2  ;;  %v1511_v4 = vpop.f32.mrb[42].mxu1  ;;  %938 = vmatmul.mubr.bf16.gmra.mrb[24].mxu0 %v772_v63 }
 0x32e   :  { %v764_v5 = vmax.f32 %v732_v1, 0.0  ;;  %v735_v6 = vadd.f32 %v1511_v4, %v1299_v36  ;;  %v726_v7 = vpop.f32.mrb[43].mxu1  ;;  %947 = vmatprep.mubr.bf16.mxu0 %v1905_v35 }
 0x32f   :  { %v727_v9 = vadd.f32 %v1299_v36, %v726_v7  ;;  %v762_v12 = vmax.f32 %v724_v3, 0.0 }
 0x330   :  { %v765_v11 = vmax.f32 %v735_v6, 0.0 }
 0x331   :  { %v763_v13 = vmax.f32 %v727_v9, 0.0 }
 0x332   :  { %v775_v14 = vpack.c.bf16 %v765_v11, %v764_v5 }
 0x333   :  { %v774_v15 = vpack.c.bf16 %v763_v13, %v762_v12  ;;  %v1514_v16 = vpop.f32.mrb[44].mxu1 }
 0x334   :  { %v748_v17 = vadd.f32 %v1514_v16, %v1299_v36  ;;  %v739_v18 = vpop.f32.mrb[45].mxu1 }
 0x335   :  { %948 = vmatmul.mubr.bf16.gmra.mrb[28].mxu0 %v773_v62  ;;  %v740_v19 = vadd.f32 %v1299_v36, %v739_v18  ;;  %v1515_v20 = vpop.f32.mrb[46].mxu1 }
 0x336   :  { %v768_v8 = vmax.f32 %v748_v17, 0.0  ;;  %v751_v21 = vadd.f32 %v1515_v20, %v1299_v36  ;;  %v742_v22 = vpop.f32.mrb[47].mxu1  ;;  %957 = vmatprep.mubr.bf16.mxu0 %v1905_v35 }
 0x337   :  { %v766_v23 = vmax.f32 %v740_v19, 0.0  ;;  %v743_v24 = vadd.f32 %v1299_v36, %v742_v22 }
 0x338   :  { %v769_v25 = vmax.f32 %v751_v21, 0.0 }
 0x339   :  { %v767_v26 = vmax.f32 %v743_v24, 0.0 }
 0x33a   :  { %v777_v27 = vpack.c.bf16 %v769_v25, %v768_v8 }
 0x33b   :  { %v776_v28 = vpack.c.bf16 %v767_v26, %v766_v23 }
 0x33d   :  { %958 = vmatmul.mubr.bf16.gmra.mrb[32].mxu0 %v774_v15 }
 0x33e   :  { %967 = vmatprep.mubr.bf16.mxu0 %v1905_v35 }
 0x345   :  { %968 = vmatmul.mubr.bf16.gmra.mrb[36].mxu0 %v775_v14 }
 0x346   :  { %977 = vmatprep.mubr.bf16.mxu0 %v1905_v35 }
 0x34d   :  { %978 = vmatmul.mubr.bf16.gmra.mrb[40].mxu0 %v776_v28 }
 0x34e   :  { %987 = vmatprep.mubr.bf16.mxu0 %v1905_v35 }
 0x355   :  { %988 = vmatmul.mubr.bf16.gmra.mrb[44].mxu0 %v777_v27 }
 0x356   :  { %1851 = shalt.err (!%p1848_p2)
}
 0x357   :  { %s1852_s0 = scalar_lea.hbm %s2158_s9, 2048 }
 0x358   :  { %p1853_p3 = scmp.ne.s32.totalorder %s2158_s9, %s1852_s0  ;;  %p1856_p4 = scmp.lt.u32.totalorder %s1852_s0, %s2158_s9 }
 0x35a   :  { %p1858_p5 = pnand %p1856_p4, %p1853_p3 }
 0x35c   :  { %1861 = shalt.err (!%p1858_p5)
}
 0x35d   :  { %1249 = dma.vmem_to_hbm [thread:$0]  %s1244_s20, 2048, %s2158_s9, [#allocation4], %s1903_s3, %s1903_s3, %s1904_s23   ;;  %v795_v29 = vlaneseq }
 0x35e   :  { %v108_v32 = vld [vmem:[%s2157_s8] sm:$0x3]  ;;  %s1907_s8 = smov [#allocation12]  }
 0x35f   :  { %v796_v30 = vshrl.u32 %v795_v29, 7  ;;  %s1255_s9 = sshll.u32 %s1907_s8, 4  ;;  %s1256_s9 = int_to_ptr.vmem [resolvable:$true] %s1255_s9 }
 0x360   :  { %s1862_s17 = scalar_lea.vmem %s1256_s9, 4096  ;;  %p1867_p7 = scmp.lt.s32.totalorder %s1256_s9, %s1256_s9 }
 0x361   :  { %v797_v31 = vsub.s32 0, %v796_v30  ;;  %v801_v33 = vsub.s32 1, %v796_v30  ;;  %p1863_p6 = scmp.ne.s32.totalorder %s1256_s9, %s1862_s17  ;;  %p1868_p8 = scmp.lt.s32.totalorder %s1862_s17, %s1862_s17 }
 0x363   :  { %v2098_v34 = vrot.slane %v108_v32, %v797_v31  ;;  %v2100_v35 = vrot.slane %v108_v32, %v801_v33  ;;  %p1869_p9 = por %p1868_p8, %p1867_p7 }
 0x365   :  { %p1870_p10 = pnand %p1869_p9, %p1863_p6 }
 0x3f0   :  { %v919_v36 = vpop.f32.mrb[16].mxu0 }
 0x3f1   :  { %v920_v37 = vadd.f32 %v919_v36, %v2098_v34  ;;  %v921_v38 = vpop.f32.mrb[17].mxu0 }
 0x3f2   :  { %v922_v39 = vadd.f32 %v921_v38, %v2100_v35  ;;  %v923_v41 = vpop.f32.mrb[18].mxu0 }
 0x3f3   :  { %v1324_v10 = vmul.f32 -1.442695, %v920_v37  ;;  %v924_v42 = vadd.f32 %v923_v41, %v2098_v34  ;;  %v925_v43 = vpop.f32.mrb[19].mxu0 }
 0x3f4   :  { %v1325_v44 = vmul.f32 -1.442695, %v922_v39  ;;  %v926_v45 = vadd.f32 %v925_v43, %v2100_v35 }
 0x3f5   :  { %1602 = vpow2.f32 %v1324_v10  ;;  %v1326_v40 = vmul.f32 -1.442695, %v924_v42 }
 0x3f6   :  { %1604 = vpow2.f32 %v1325_v44  ;;  %v1327_v46 = vmul.f32 -1.442695, %v926_v45 }
 0x3f7   :  { %1606 = vpow2.f32 %v1326_v40 }
 0x3f8   :  { %1608 = vpow2.f32 %v1327_v46  ;;  %v929_v47 = vpop.f32.mrb[20].mxu0 }
 0x3f9   :  { %v930_v48 = vadd.f32 %v929_v47, %v2098_v34  ;;  %v931_v49 = vpop.f32.mrb[21].mxu0 }
 0x3fa   :  { %v932_v50 = vadd.f32 %v931_v49, %v2100_v35  ;;  %v933_v51 = vpop.f32.mrb[22].mxu0 }
 0x3fb   :  { %v1328_v52 = vmul.f32 -1.442695, %v930_v48  ;;  %v934_v53 = vadd.f32 %v933_v51, %v2098_v34  ;;  %v935_v54 = vpop.f32.mrb[23].mxu0 }
 0x3fc   :  { %v1329_v55 = vmul.f32 -1.442695, %v932_v50  ;;  %v936_v56 = vadd.f32 %v935_v54, %v2100_v35 }
 0x3fd   :  { %1610 = vpow2.f32 %v1328_v52  ;;  %v1330_v57 = vmul.f32 -1.442695, %v934_v53 }
 0x3fe   :  { %1612 = vpow2.f32 %v1329_v55  ;;  %v1331_v58 = vmul.f32 -1.442695, %v936_v56 }
 0x3ff   :  { %v1603_v59 = vpop.eup %1602  ;;  %1614 = vpow2.f32 %v1330_v57 }
 0x400   :  { %v1605_v60 = vpop.eup %1604  ;;  %v1094_v61 = vadd.f32 1.0, %v1603_v59  ;;  %1616 = vpow2.f32 %v1331_v58  ;;  %v939_v62 = vpop.f32.mrb[24].mxu0 }
 0x401   :  { %v1607_v63 = vpop.eup %1606  ;;  %v1095_v0 = vadd.f32 1.0, %v1605_v60  ;;  %v940_v1 = vadd.f32 %v939_v62, %v2098_v34  ;;  %v941_v2 = vpop.f32.mrb[25].mxu0 }
 0x402   :  { %v1609_v3 = vpop.eup %1608  ;;  %1618 = vrcp.f32 %v1094_v61  ;;  %v1096_v4 = vadd.f32 1.0, %v1607_v63  ;;  %v942_v5 = vadd.f32 %v941_v2, %v2100_v35  ;;  %v943_v6 = vpop.f32.mrb[26].mxu0 }
 0x403   :  { %1620 = vrcp.f32 %v1095_v0  ;;  %v1097_v7 = vadd.f32 1.0, %v1609_v3  ;;  %v1332_v9 = vmul.f32 -1.442695, %v940_v1  ;;  %v944_v11 = vadd.f32 %v943_v6, %v2098_v34  ;;  %v945_v12 = vpop.f32.mrb[27].mxu0 }
 0x404   :  { %1622 = vrcp.f32 %v1096_v4  ;;  %v1333_v13 = vmul.f32 -1.442695, %v942_v5  ;;  %v946_v14 = vadd.f32 %v945_v12, %v2100_v35 }
 0x405   :  { %1624 = vrcp.f32 %v1097_v7  ;;  %v1334_v15 = vmul.f32 -1.442695, %v944_v11 }
 0x406   :  { %1626 = vpow2.f32 %v1332_v9  ;;  %v1335_v16 = vmul.f32 -1.442695, %v946_v14 }
 0x407   :  { %v1611_v17 = vpop.eup %1610  ;;  %1628 = vpow2.f32 %v1333_v13 }
 0x408   :  { %v1613_v18 = vpop.eup %1612  ;;  %v1098_v19 = vadd.f32 1.0, %v1611_v17  ;;  %1630 = vpow2.f32 %v1334_v15  ;;  %v949_v20 = vpop.f32.mrb[28].mxu0 }
 0x409   :  { %v1615_v8 = vpop.eup %1614  ;;  %v1099_v21 = vadd.f32 1.0, %v1613_v18  ;;  %1632 = vpow2.f32 %v1335_v16  ;;  %v950_v22 = vadd.f32 %v949_v20, %v2098_v34  ;;  %v951_v23 = vpop.f32.mrb[29].mxu0 }
 0x40a   :  { %v1617_v24 = vpop.eup %1616  ;;  %1634 = vrcp.f32 %v1098_v19  ;;  %v1100_v25 = vadd.f32 1.0, %v1615_v8  ;;  %v952_v26 = vadd.f32 %v951_v23, %v2100_v35  ;;  %v953_v27 = vpop.f32.mrb[30].mxu0 }
 0x40b   :  { %1636 = vrcp.f32 %v1099_v21  ;;  %v1101_v28 = vadd.f32 1.0, %v1617_v24  ;;  %v1336_v29 = vmul.f32 -1.442695, %v950_v22  ;;  %v954_v30 = vadd.f32 %v953_v27, %v2098_v34  ;;  %v955_v31 = vpop.f32.mrb[31].mxu0 }
 0x40c   :  { %v1619_v32 = vpop.eup %1618  ;;  %1638 = vrcp.f32 %v1100_v25  ;;  %v1337_v33 = vmul.f32 -1.442695, %v952_v26  ;;  %v956_v36 = vadd.f32 %v955_v31, %v2100_v35 }
 0x40d   :  { %v1621_v37 = vpop.eup %1620  ;;  %1206 = vst [vmem:[#allocation12] sm:$0xff] %v1619_v32  ;;  %1640 = vrcp.f32 %v1101_v28  ;;  %v1338_v38 = vmul.f32 -1.442695, %v954_v30 }
 0x40e   :  { %v1623_v39 = vpop.eup %1622  ;;  %1207 = vst [vmem:[#allocation12 + $0x8] sm:$0xff] %v1621_v37  ;;  %1642 = vpow2.f32 %v1336_v29  ;;  %v1339_v41 = vmul.f32 -1.442695, %v956_v36 }
 0x40f   :  { %v1625_v10 = vpop.eup %1624  ;;  %1208 = vst [vmem:[#allocation12 + $0x10] sm:$0xff] %v1623_v39  ;;  %1644 = vpow2.f32 %v1337_v33 }
 0x410   :  { %v1627_v42 = vpop.eup %1626  ;;  %1209 = vst [vmem:[#allocation12 + $0x18] sm:$0xff] %v1625_v10  ;;  %1646 = vpow2.f32 %v1338_v38  ;;  %v959_v43 = vpop.f32.mrb[32].mxu0 }
 0x411   :  { %v1629_v44 = vpop.eup %1628  ;;  %v1102_v45 = vadd.f32 1.0, %v1627_v42  ;;  %1648 = vpow2.f32 %v1339_v41  ;;  %v960_v40 = vadd.f32 %v959_v43, %v2098_v34  ;;  %v961_v46 = vpop.f32.mrb[33].mxu0 }
 0x412   :  { %v1631_v47 = vpop.eup %1630  ;;  %v1103_v48 = vadd.f32 1.0, %v1629_v44  ;;  %v962_v49 = vadd.f32 %v961_v46, %v2100_v35  ;;  %v963_v50 = vpop.f32.mrb[34].mxu0 }
 0x413   :  { %v1633_v51 = vpop.eup %1632  ;;  %1650 = vrcp.f32 %v1102_v45  ;;  %v1104_v52 = vadd.f32 1.0, %v1631_v47  ;;  %v1340_v53 = vmul.f32 -1.442695, %v960_v40  ;;  %v964_v54 = vadd.f32 %v963_v50, %v2098_v34  ;;  %v965_v55 = vpop.f32.mrb[35].mxu0 }
 0x414   :  { %v1635_v56 = vpop.eup %1634  ;;  %1652 = vrcp.f32 %v1103_v48  ;;  %v1105_v57 = vadd.f32 1.0, %v1633_v51  ;;  %v1341_v58 = vmul.f32 -1.442695, %v962_v49  ;;  %v966_v59 = vadd.f32 %v965_v55, %v2100_v35 }
 0x415   :  { %v1637_v60 = vpop.eup %1636  ;;  %1210 = vst [vmem:[#allocation12 + $0x20] sm:$0xff] %v1635_v56  ;;  %1654 = vrcp.f32 %v1104_v52  ;;  %v1342_v61 = vmul.f32 -1.442695, %v964_v54 }
 0x416   :  { %v1639_v62 = vpop.eup %1638  ;;  %1211 = vst [vmem:[#allocation12 + $0x28] sm:$0xff] %v1637_v60  ;;  %1656 = vrcp.f32 %v1105_v57  ;;  %v1343_v63 = vmul.f32 -1.442695, %v966_v59 }
 0x417   :  { %v1641_v0 = vpop.eup %1640  ;;  %1212 = vst [vmem:[#allocation12 + $0x30] sm:$0xff] %v1639_v62  ;;  %1658 = vpow2.f32 %v1340_v53 }
 0x418   :  { %v1643_v1 = vpop.eup %1642  ;;  %1213 = vst [vmem:[#allocation12 + $0x38] sm:$0xff] %v1641_v0  ;;  %1660 = vpow2.f32 %v1341_v58  ;;  %v969_v2 = vpop.f32.mrb[36].mxu0 }
 0x419   :  { %v1645_v3 = vpop.eup %1644  ;;  %v1106_v4 = vadd.f32 1.0, %v1643_v1  ;;  %1662 = vpow2.f32 %v1342_v61  ;;  %v970_v5 = vadd.f32 %v969_v2, %v2098_v34  ;;  %v971_v6 = vpop.f32.mrb[37].mxu0 }
 0x41a   :  { %v1647_v7 = vpop.eup %1646  ;;  %v1107_v9 = vadd.f32 1.0, %v1645_v3  ;;  %1664 = vpow2.f32 %v1343_v63  ;;  %v972_v11 = vadd.f32 %v971_v6, %v2100_v35  ;;  %v973_v12 = vpop.f32.mrb[38].mxu0 }
 0x41b   :  { %v1649_v13 = vpop.eup %1648  ;;  %1666 = vrcp.f32 %v1106_v4  ;;  %v1108_v14 = vadd.f32 1.0, %v1647_v7  ;;  %v1344_v15 = vmul.f32 -1.442695, %v970_v5  ;;  %v974_v16 = vadd.f32 %v973_v12, %v2098_v34  ;;  %v975_v17 = vpop.f32.mrb[39].mxu0 }
 0x41c   :  { %1668 = vrcp.f32 %v1107_v9  ;;  %v1109_v18 = vadd.f32 1.0, %v1649_v13  ;;  %v1345_v19 = vmul.f32 -1.442695, %v972_v11  ;;  %v976_v20 = vadd.f32 %v975_v17, %v2100_v35 }
 0x41d   :  { %v1651_v8 = vpop.eup %1650  ;;  %1670 = vrcp.f32 %v1108_v14  ;;  %v1346_v21 = vmul.f32 -1.442695, %v974_v16 }
 0x41e   :  { %v1653_v22 = vpop.eup %1652  ;;  %1214 = vst [vmem:[#allocation12 + $0x40] sm:$0xff] %v1651_v8  ;;  %1672 = vrcp.f32 %v1109_v18  ;;  %v1347_v23 = vmul.f32 -1.442695, %v976_v20 }
 0x41f   :  { %v1655_v24 = vpop.eup %1654  ;;  %1215 = vst [vmem:[#allocation12 + $0x48] sm:$0xff] %v1653_v22  ;;  %1674 = vpow2.f32 %v1344_v15 }
 0x420   :  { %v1657_v25 = vpop.eup %1656  ;;  %1216 = vst [vmem:[#allocation12 + $0x50] sm:$0xff] %v1655_v24  ;;  %1676 = vpow2.f32 %v1345_v19  ;;  %v979_v26 = vpop.f32.mrb[40].mxu0 }
 0x421   :  { %v1659_v27 = vpop.eup %1658  ;;  %1217 = vst [vmem:[#allocation12 + $0x58] sm:$0xff] %v1657_v25  ;;  %1678 = vpow2.f32 %v1346_v21  ;;  %v980_v28 = vadd.f32 %v979_v26, %v2098_v34  ;;  %v981_v29 = vpop.f32.mrb[41].mxu0 }
 0x422   :  { %v1661_v30 = vpop.eup %1660  ;;  %v1110_v31 = vadd.f32 1.0, %v1659_v27  ;;  %1680 = vpow2.f32 %v1347_v23  ;;  %v982_v32 = vadd.f32 %v981_v29, %v2100_v35  ;;  %v983_v33 = vpop.f32.mrb[42].mxu0 }
 0x423   :  { %v1663_v36 = vpop.eup %1662  ;;  %v1111_v37 = vadd.f32 1.0, %v1661_v30  ;;  %v984_v38 = vadd.f32 %v983_v33, %v2098_v34  ;;  %v985_v39 = vpop.f32.mrb[43].mxu0  ;;  %v1348_v42 = vmul.f32 -1.442695, %v980_v28 }
 0x424   :  { %v1665_v41 = vpop.eup %1664  ;;  %1682 = vrcp.f32 %v1110_v31  ;;  %v1112_v10 = vadd.f32 1.0, %v1663_v36  ;;  %v986_v43 = vadd.f32 %v985_v39, %v2100_v35  ;;  %v1349_v40 = vmul.f32 -1.442695, %v982_v32 }
 0x425   :  { %v1667_v44 = vpop.eup %1666  ;;  %1684 = vrcp.f32 %v1111_v37  ;;  %v1113_v45 = vadd.f32 1.0, %v1665_v41  ;;  %v1350_v47 = vmul.f32 -1.442695, %v984_v38 }
 0x426   :  { %v1669_v46 = vpop.eup %1668  ;;  %1218 = vst [vmem:[#allocation12 + $0x60] sm:$0xff] %v1667_v44  ;;  %1686 = vrcp.f32 %v1112_v10  ;;  %v1351_v49 = vmul.f32 -1.442695, %v986_v43 }
 0x427   :  { %v1671_v48 = vpop.eup %1670  ;;  %1219 = vst [vmem:[#allocation12 + $0x68] sm:$0xff] %v1669_v46  ;;  %1688 = vrcp.f32 %v1113_v45 }
 0x428   :  { %v1673_v50 = vpop.eup %1672  ;;  %1220 = vst [vmem:[#allocation12 + $0x70] sm:$0xff] %v1671_v48  ;;  %1690 = vpow2.f32 %v1348_v42  ;;  %v989_v51 = vpop.f32.mrb[44].mxu0 }
 0x429   :  { %v1675_v52 = vpop.eup %1674  ;;  %1221 = vst [vmem:[#allocation12 + $0x78] sm:$0xff] %v1673_v50  ;;  %1692 = vpow2.f32 %v1349_v40  ;;  %v990_v53 = vadd.f32 %v989_v51, %v2098_v34  ;;  %v991_v54 = vpop.f32.mrb[45].mxu0 }
 0x42a   :  { %v1677_v55 = vpop.eup %1676  ;;  %v1114_v56 = vadd.f32 1.0, %v1675_v52  ;;  %1694 = vpow2.f32 %v1350_v47  ;;  %v992_v57 = vadd.f32 %v991_v54, %v2100_v35  ;;  %v993_v58 = vpop.f32.mrb[46].mxu0 }
 0x42b   :  { %v1679_v59 = vpop.eup %1678  ;;  %v1115_v60 = vadd.f32 1.0, %v1677_v55  ;;  %1696 = vpow2.f32 %v1351_v49  ;;  %v994_v61 = vadd.f32 %v993_v58, %v2098_v34  ;;  %v995_v62 = vpop.f32.mrb[47].mxu0  ;;  %v1352_v1 = vmul.f32 -1.442695, %v990_v53 }
 0x42c   :  { %v1681_v63 = vpop.eup %1680  ;;  %1698 = vrcp.f32 %v1114_v56  ;;  %v1116_v0 = vadd.f32 1.0, %v1679_v59  ;;  %v996_v2 = vadd.f32 %v995_v62, %v2100_v35  ;;  %v1353_v4 = vmul.f32 -1.442695, %v992_v57 }
 0x42d   :  { %1700 = vrcp.f32 %v1115_v60  ;;  %v1117_v3 = vadd.f32 1.0, %v1681_v63  ;;  %v1354_v6 = vmul.f32 -1.442695, %v994_v61 }
 0x42e   :  { %v1683_v5 = vpop.eup %1682  ;;  %1702 = vrcp.f32 %v1116_v0  ;;  %v1355_v9 = vmul.f32 -1.442695, %v996_v2 }
 0x42f   :  { %v1685_v7 = vpop.eup %1684  ;;  %1222 = vst [vmem:[#allocation12 + $0x80] sm:$0xff] %v1683_v5  ;;  %1704 = vrcp.f32 %v1117_v3 }
 0x430   :  { %v1687_v11 = vpop.eup %1686  ;;  %1223 = vst [vmem:[#allocation12 + $0x88] sm:$0xff] %v1685_v7  ;;  %1706 = vpow2.f32 %v1352_v1 }
 0x431   :  { %v1689_v34 = vpop.eup %1688  ;;  %1224 = vst [vmem:[#allocation12 + $0x90] sm:$0xff] %v1687_v11  ;;  %1708 = vpow2.f32 %v1353_v4 }
 0x432   :  { %v1691_v12 = vpop.eup %1690  ;;  %1225 = vst [vmem:[#allocation12 + $0x98] sm:$0xff] %v1689_v34  ;;  %1710 = vpow2.f32 %v1354_v6 }
 0x433   :  { %v1693_v35 = vpop.eup %1692  ;;  %v1118_v13 = vadd.f32 1.0, %v1691_v12  ;;  %1712 = vpow2.f32 %v1355_v9 }
 0x434   :  { %v1695_v14 = vpop.eup %1694  ;;  %v1119_v15 = vadd.f32 1.0, %v1693_v35 }
 0x435   :  { %v1697_v16 = vpop.eup %1696  ;;  %1714 = vrcp.f32 %v1118_v13  ;;  %v1120_v17 = vadd.f32 1.0, %v1695_v14 }
 0x436   :  { %v1699_v18 = vpop.eup %1698  ;;  %1716 = vrcp.f32 %v1119_v15  ;;  %v1121_v19 = vadd.f32 1.0, %v1697_v16 }
 0x437   :  { %v1701_v20 = vpop.eup %1700  ;;  %1226 = vst [vmem:[#allocation12 + $0xa0] sm:$0xff] %v1699_v18  ;;  %1718 = vrcp.f32 %v1120_v17 }
 0x438   :  { %v1703_v8 = vpop.eup %1702  ;;  %1227 = vst [vmem:[#allocation12 + $0xa8] sm:$0xff] %v1701_v20  ;;  %1720 = vrcp.f32 %v1121_v19 }
 0x439   :  { %v1705_v21 = vpop.eup %1704  ;;  %1228 = vst [vmem:[#allocation12 + $0xb0] sm:$0xff] %v1703_v8 }
 0x43a   :  { %v1707_v22 = vpop.eup %1706  ;;  %1229 = vst [vmem:[#allocation12 + $0xb8] sm:$0xff] %v1705_v21 }
 0x43b   :  { %v1709_v23 = vpop.eup %1708  ;;  %v1122_v24 = vadd.f32 1.0, %v1707_v22 }
 0x43c   :  { %v1711_v25 = vpop.eup %1710  ;;  %v1123_v26 = vadd.f32 1.0, %v1709_v23 }
 0x43d   :  { %v1713_v27 = vpop.eup %1712  ;;  %1722 = vrcp.f32 %v1122_v24  ;;  %v1124_v28 = vadd.f32 1.0, %v1711_v25 }
 0x43e   :  { %1724 = vrcp.f32 %v1123_v26  ;;  %v1125_v29 = vadd.f32 1.0, %v1713_v27 }
 0x43f   :  { %v1715_v30 = vpop.eup %1714  ;;  %1726 = vrcp.f32 %v1124_v28 }
 0x440   :  { %v1717_v31 = vpop.eup %1716  ;;  %1230 = vst [vmem:[#allocation12 + $0xc0] sm:$0xff] %v1715_v30  ;;  %1728 = vrcp.f32 %v1125_v29 }
 0x441   :  { %v1719_v32 = vpop.eup %1718  ;;  %1231 = vst [vmem:[#allocation12 + $0xc8] sm:$0xff] %v1717_v31 }
 0x442   :  { %v1721_v33 = vpop.eup %1720  ;;  %1232 = vst [vmem:[#allocation12 + $0xd0] sm:$0xff] %v1719_v32 }
 0x443   :  { %1233 = vst [vmem:[#allocation12 + $0xd8] sm:$0xff] %v1721_v33 }
 0x447   :  { %v1723_v36 = vpop.eup %1722 }
 0x448   :  { %v1725_v37 = vpop.eup %1724  ;;  %1234 = vst [vmem:[#allocation12 + $0xe0] sm:$0xff] %v1723_v36 }
 0x449   :  { %v1727_v38 = vpop.eup %1726  ;;  %1235 = vst [vmem:[#allocation12 + $0xe8] sm:$0xff] %v1725_v37 }
 0x44a   :  { %v1729_v39 = vpop.eup %1728  ;;  %1236 = vst [vmem:[#allocation12 + $0xf0] sm:$0xff] %v1727_v38 }
 0x44b   :  { %1237 = vst [vmem:[#allocation12 + $0xf8] sm:$0xff] %v1729_v39 }
 0x44c   :  { %1873 = shalt.err (!%p1870_p10)
}
 0x44d   :  { %s1874_s23 = scalar_lea.hbm %s2159_s10, 4096 }
 0x44e   :  { %p1875_p11 = scmp.ne.s32.totalorder %s2159_s10, %s1874_s23  ;;  %p1878_p12 = scmp.lt.u32.totalorder %s1874_s23, %s2159_s10 }
 0x450   :  { %p1880_p13 = pnand %p1878_p12, %p1875_p11 }
 0x452   :  { %1883 = shalt.err (!%p1880_p13)
}
 0x453   :  { %1261 = dma.vmem_to_hbm [thread:$0]  %s1256_s9, 4096, %s2159_s10, [#allocation13], %s1899_s5, %s1899_s5, %s1900_s28  }
 0x454   :  { %1890 = dma.done.wait [#allocation4], 2048  }
 0x455   :  { %1891 = vsyncadd [#allocation4], 4294965248 }
 0x456   :  { %1892 = dma.done.wait [#allocation13], 4096  }
 0x457   :  { %1893 = vsyncadd [#allocation13], 4294963200 }
 0x458   :  { %1268 = vsyncpa [#allocation3], 1 }
 0x459   :  { %1269 = vsyncpa [#allocation6], 1 }
 0x45a   :  { %1270 = vsyncpa [#allocation9], 1 }
 0x45b   :  { %1271 = vsyncpa [#allocation4], 1 }
 0x45c   :  { %1272 = vsyncpa [#allocation13], 1 }

</bundles_post_ra>
